<compile_context>
chip_gen: v7x
topology: tpu7x:2x2x1
jax: 0.10.0
libtpu: 0.0.40
codegen_flags: <defaults>
</compile_context>

<pallas_src>
import functools
import math

import jax
import jax.numpy as jnp
from jax.experimental import pallas as pl
from jax.experimental.pallas import tpu as pltpu

# ---- module hyper-parameters (small, consistent with __init__) -------------
PARAMS = dict(t_steps=8, n_neurons=32, n_layers=0, subset=1,
              dlo_only=0, obj_only=0, obj_input=1)
LR = 0.01  # nn.ParameterList of learning rates; not used in forward()

N_ACTIONS = PARAMS["t_steps"]
N_NEURONS = PARAMS["n_neurons"]
IN_DIM = 117 if PARAMS["subset"] == 0 else 78
if PARAMS["dlo_only"] == 1:
    OUT_DIM = 32 * 2
    if PARAMS["obj_input"] == 0:
        IN_DIM = 66
elif PARAMS["obj_only"] == 1:
    OUT_DIM = 3 * 2
else:
    OUT_DIM = 78

A_DIM = N_ACTIONS * 2               # width of the action input
XA_DIM = IN_DIM + A_DIM             # logical first-layer input width
OUT_PAD = 128 * ((OUT_DIM + 127) // 128)   # lane-dense output width (128)

NEG_SLOPE = 0.01  # F.leaky_relu default


def _leaky_relu(v):
    return jnp.where(v > 0, v, NEG_SLOPE * v)


def _round_up(n, m):
    return ((n + m - 1) // m) * m


# ---------------------------------------------------------------------------
# Kernel: 4-layer MLP on one (bm, ...) batch tile, everything resident in VMEM.
# Concat is fused into the first layer: x @ W0x + a @ W0a == concat(x, a) @ W0.
# ---------------------------------------------------------------------------
def mlp_kernel(x_ref, a_ref,
               w0x_ref, w0a_ref, b0_ref,
               w1_ref, b1_ref,
               w2_ref, b2_ref,
               w3_ref, b3_ref,
               y_ref):
    cdt = w0x_ref.dtype  # MXU operand dtype (f32 or bf16); accumulation is f32
    x = x_ref[...].astype(cdt)
    a = a_ref[...].astype(cdt)
    h = _leaky_relu(
        jnp.dot(x, w0x_ref[...], preferred_element_type=jnp.float32)
        + jnp.dot(a, w0a_ref[...], preferred_element_type=jnp.float32)
        + b0_ref[...])
    h = _leaky_relu(
        jnp.dot(h.astype(cdt), w1_ref[...], preferred_element_type=jnp.float32)
        + b1_ref[...])
    h = _leaky_relu(
        jnp.dot(h.astype(cdt), w2_ref[...], preferred_element_type=jnp.float32)
        + b2_ref[...])
    y = (jnp.dot(h.astype(cdt), w3_ref[...], preferred_element_type=jnp.float32)
         + b3_ref[...])
    y_ref[...] = y.astype(y_ref.dtype)   # unmasked (bm, 128) lane-dense store


# ---------------------------------------------------------------------------
# One-time weight reformat (hoisted out of the per-call path).
# ---------------------------------------------------------------------------
def pack_theta(theta, compute_dtype=jnp.float32):
    """Transpose to (in, out), split W0 at the concat boundary, zero-pad the
    output layer to a lane-dense 128 columns, optionally cast weights to bf16."""
    w0 = theta[0]                                           # (32, XA_DIM)
    w0x = w0[:, :IN_DIM].T.astype(compute_dtype)            # (IN_DIM, 32)
    w0a = w0[:, IN_DIM:].T.astype(compute_dtype)            # (A_DIM, 32)
    b0 = theta[1][None, :].astype(jnp.float32)
    w1 = theta[2].T.astype(compute_dtype)
    b1 = theta[3][None, :].astype(jnp.float32)
    w2 = theta[4].T.astype(compute_dtype)
    b2 = theta[5][None, :].astype(jnp.float32)
    w3 = jnp.zeros((N_NEURONS, OUT_PAD), compute_dtype)
    w3 = w3.at[:, :OUT_DIM].set(theta[6].T.astype(compute_dtype))
    b3 = jnp.zeros((1, OUT_PAD), jnp.float32)
    b3 = b3.at[:, :OUT_DIM].set(theta[7].astype(jnp.float32))
    return (w0x, w0a, b0, w1, b1, w2, b2, w3, b3)


# ---------------------------------------------------------------------------
# Wrapper: pads the batch to a tile multiple, runs the grid, slices the result.
# ---------------------------------------------------------------------------
@functools.partial(jax.jit, static_argnames=("bm",))
def maml_forward(x, a, packed, *, bm=None):
    B = x.shape[0]
    if bm is None:
        bm = min(_round_up(B, 8), 256)   # big tile; multiple of 8 sublanes
    bm = _round_up(bm, 8)
    B_pad = _round_up(B, bm)
    if B_pad != B:
        x = jnp.pad(x, ((0, B_pad - B), (0, 0)))
        a = jnp.pad(a, ((0, B_pad - B), (0, 0)))

    (w0x, w0a, b0, w1, b1, w2, b2, w3, b3) = packed

    def full_spec(arr):
        return pl.BlockSpec(arr.shape, lambda i: (0,) * arr.ndim)

    grid = (B_pad // bm,)
    out = pl.pallas_call(
        mlp_kernel,
        out_shape=jax.ShapeDtypeStruct((B_pad, OUT_PAD), jnp.float32),
        grid_spec=pltpu.PrefetchScalarGridSpec(
            num_scalar_prefetch=0,
            grid=grid,
            in_specs=[
                pl.BlockSpec((bm, IN_DIM), lambda i: (i, 0)),
                pl.BlockSpec((bm, A_DIM), lambda i: (i, 0)),
                full_spec(w0x), full_spec(w0a), full_spec(b0),
                full_spec(w1), full_spec(b1),
                full_spec(w2), full_spec(b2),
                full_spec(w3), full_spec(b3),
            ],
            out_specs=pl.BlockSpec((bm, OUT_PAD), lambda i: (i, 0)),
        ),
        compiler_params=pltpu.CompilerParams(
            dimension_semantics=("parallel",)),
    )(x, a, w0x, w0a, b0, w1, b1, w2, b2, w3, b3)

    return out[:B, :OUT_DIM]


# ---------------------------------------------------------------------------
# Init + plain-JAX reference (mirrors the PyTorch module, n_layers == 0).
# ---------------------------------------------------------------------------
def init_theta(key):
    """zeros, then kaiming_uniform_ on 2-D params (as in __init__)."""
    theta_shapes = [
        [N_NEURONS, XA_DIM], [N_NEURONS],
        [N_NEURONS, N_NEURONS], [N_NEURONS],
        [N_NEURONS, N_NEURONS], [N_NEURONS],
        [OUT_DIM, N_NEURONS], [OUT_DIM],
    ]
    theta = []
    for shape in theta_shapes:
        if len(shape) > 1:
            fan_in = shape[1]
            bound = math.sqrt(2.0) * math.sqrt(3.0 / fan_in)
            key, sub = jax.random.split(key)
            theta.append(jax.random.uniform(sub, tuple(shape), jnp.float32,
                                            minval=-bound, maxval=bound))
        else:
            theta.append(jnp.zeros(tuple(shape), jnp.float32))
    return theta


def reference_forward(x, a, theta):
    xa = jnp.concatenate([x, a], axis=-1)
    h = _leaky_relu(xa @ theta[0].T + theta[1])
    h = _leaky_relu(h @ theta[2].T + theta[3])
    h = _leaky_relu(h @ theta[4].T + theta[5])
    return h @ theta[6].T + theta[7]


if __name__ == "__main__":
    key = jax.random.PRNGKey(0)
    k_theta, k_x, k_a = jax.random.split(key, 3)

    theta = init_theta(k_theta)

    B = 16
    x = jax.random.normal(k_x, (B, IN_DIM), jnp.float32)
    a = jax.random.normal(k_a, (B, N_ACTIONS * 2), jnp.float32)

    y_ref = reference_forward(x, a, theta)

    # f32 path (exact reproduction of the PyTorch forward).
    packed_f32 = pack_theta(theta, jnp.float32)
    y = jax.block_until_ready(maml_forward(x, a, packed_f32))
    assert y.shape == (B, OUT_DIM)
    assert jnp.allclose(y, y_ref, atol=1e-4, rtol=1e-4), "f32 mismatch vs reference"

    # Batch not a multiple of the tile (exercises the padding/tail path).
    y13 = jax.block_until_ready(maml_forward(x[:13], a[:13], packed_f32))
    assert y13.shape == (13, OUT_DIM)
    assert jnp.allclose(y13, y_ref[:13], atol=1e-4, rtol=1e-4), "tail mismatch"

    # bf16 MXU-operand path (f32 accumulation) — loose tolerance.
    packed_bf16 = pack_theta(theta, jnp.bfloat16)
    y_bf16 = jax.block_until_ready(maml_forward(x, a, packed_bf16))
    assert y_bf16.shape == (B, OUT_DIM)
    assert jnp.allclose(y_bf16, y_ref, atol=5e-1, rtol=1e-1), "bf16 mismatch"

    print("KERNEL_OK")
</pallas_src>

<mosaic_0001>
module attributes {stable_mosaic.version = 11 : i64} {
  func.func @mlp_kernel(%arg0: i32, %arg1: memref<16x78xf32, #tpu.memory_space<vmem>>, %arg2: memref<16x16xf32, #tpu.memory_space<vmem>>, %arg3: memref<78x32xf32, #tpu.memory_space<vmem>>, %arg4: memref<16x32xf32, #tpu.memory_space<vmem>>, %arg5: memref<1x32xf32, #tpu.memory_space<vmem>>, %arg6: memref<32x32xf32, #tpu.memory_space<vmem>>, %arg7: memref<1x32xf32, #tpu.memory_space<vmem>>, %arg8: memref<32x32xf32, #tpu.memory_space<vmem>>, %arg9: memref<1x32xf32, #tpu.memory_space<vmem>>, %arg10: memref<32x128xf32, #tpu.memory_space<vmem>>, %arg11: memref<1x128xf32, #tpu.memory_space<vmem>>, %arg12: memref<16x128xf32, #tpu.memory_space<vmem>>) attributes {dimension_semantics = [#tpu.dimension_semantics<parallel>], iteration_bounds = array<i64: 1>, scalar_prefetch = 0 : i64, scratch_operands = 0 : i64, tpu.core_type = #tpu.core_type<tc>, window_params = [{transform_indices = @transform_0, window_bounds = array<i64: 16, 78>}, {transform_indices = @transform_1, window_bounds = array<i64: 16, 16>}, {pipeline_mode = #tpu.pipeline_mode<synchronous>, transform_indices = @transform_2, window_bounds = array<i64: 78, 32>}, {pipeline_mode = #tpu.pipeline_mode<synchronous>, transform_indices = @transform_3, window_bounds = array<i64: 16, 32>}, {pipeline_mode = #tpu.pipeline_mode<synchronous>, transform_indices = @transform_4, window_bounds = array<i64: 1, 32>}, {pipeline_mode = #tpu.pipeline_mode<synchronous>, transform_indices = @transform_5, window_bounds = array<i64: 32, 32>}, {pipeline_mode = #tpu.pipeline_mode<synchronous>, transform_indices = @transform_6, window_bounds = array<i64: 1, 32>}, {pipeline_mode = #tpu.pipeline_mode<synchronous>, transform_indices = @transform_7, window_bounds = array<i64: 32, 32>}, {pipeline_mode = #tpu.pipeline_mode<synchronous>, transform_indices = @transform_8, window_bounds = array<i64: 1, 32>}, {pipeline_mode = #tpu.pipeline_mode<synchronous>, transform_indices = @transform_9, window_bounds = array<i64: 32, 128>}, {pipeline_mode = #tpu.pipeline_mode<synchronous>, transform_indices = @transform_10, window_bounds = array<i64: 1, 128>}, {transform_indices = @transform_11, window_bounds = array<i64: 16, 128>}]} {
    %c0 = arith.constant 0 : index
    %c0_0 = arith.constant 0 : index
    %0 = vector.load %arg1[%c0, %c0_0] : memref<16x78xf32, #tpu.memory_space<vmem>>, vector<16x78xf32>
    %c0_1 = arith.constant 0 : index
    %c0_2 = arith.constant 0 : index
    %1 = vector.load %arg2[%c0_1, %c0_2] : memref<16x16xf32, #tpu.memory_space<vmem>>, vector<16x16xf32>
    %c0_3 = arith.constant 0 : index
    %c0_4 = arith.constant 0 : index
    %2 = vector.load %arg3[%c0_3, %c0_4] : memref<78x32xf32, #tpu.memory_space<vmem>>, vector<78x32xf32>
    %cst = arith.constant dense<0.000000e+00> : vector<16x32xf32>
    %3 = tpu.matmul %0, %2, %cst {dimension_numbers = #tpu.dot_dimension_numbers<[1], [0], [0], [1], [0, 0, 1, 1], [], []>} : vector<16x78xf32>, vector<78x32xf32>, vector<16x32xf32> -> vector<16x32xf32>
    %c0_5 = arith.constant 0 : index
    %c0_6 = arith.constant 0 : index
    %4 = vector.load %arg4[%c0_5, %c0_6] : memref<16x32xf32, #tpu.memory_space<vmem>>, vector<16x32xf32>
    %cst_7 = arith.constant dense<0.000000e+00> : vector<16x32xf32>
    %5 = tpu.matmul %1, %4, %cst_7 {dimension_numbers = #tpu.dot_dimension_numbers<[1], [0], [0], [1], [0, 0, 1, 1], [], []>} : vector<16x16xf32>, vector<16x32xf32>, vector<16x32xf32> -> vector<16x32xf32>
    %6 = arith.addf %3, %5 : vector<16x32xf32>
    %c0_8 = arith.constant 0 : index
    %c0_9 = arith.constant 0 : index
    %7 = vector.load %arg5[%c0_8, %c0_9] : memref<1x32xf32, #tpu.memory_space<vmem>>, vector<1x32xf32>
    %8 = vector.broadcast %7 : vector<1x32xf32> to vector<16x32xf32>
    %9 = arith.addf %6, %8 : vector<16x32xf32>
    %cst_10 = arith.constant 0.000000e+00 : f32
    %10 = vector.broadcast %cst_10 : f32 to vector<16x32xf32>
    %11 = arith.cmpf ogt, %9, %10 : vector<16x32xf32>
    %cst_11 = arith.constant 0.00999999977 : f32
    %12 = vector.broadcast %cst_11 : f32 to vector<16x32xf32>
    %13 = arith.mulf %12, %9 : vector<16x32xf32>
    %14 = arith.select %11, %9, %13 : vector<16x32xi1>, vector<16x32xf32>
    %c0_12 = arith.constant 0 : index
    %c0_13 = arith.constant 0 : index
    %15 = vector.load %arg6[%c0_12, %c0_13] : memref<32x32xf32, #tpu.memory_space<vmem>>, vector<32x32xf32>
    %cst_14 = arith.constant dense<0.000000e+00> : vector<16x32xf32>
    %16 = tpu.matmul %14, %15, %cst_14 {dimension_numbers = #tpu.dot_dimension_numbers<[1], [0], [0], [1], [0, 0, 1, 1], [], []>} : vector<16x32xf32>, vector<32x32xf32>, vector<16x32xf32> -> vector<16x32xf32>
    %c0_15 = arith.constant 0 : index
    %c0_16 = arith.constant 0 : index
    %17 = vector.load %arg7[%c0_15, %c0_16] : memref<1x32xf32, #tpu.memory_space<vmem>>, vector<1x32xf32>
    %18 = vector.broadcast %17 : vector<1x32xf32> to vector<16x32xf32>
    %19 = arith.addf %16, %18 : vector<16x32xf32>
    %cst_17 = arith.constant 0.000000e+00 : f32
    %20 = vector.broadcast %cst_17 : f32 to vector<16x32xf32>
    %21 = arith.cmpf ogt, %19, %20 : vector<16x32xf32>
    %cst_18 = arith.constant 0.00999999977 : f32
    %22 = vector.broadcast %cst_18 : f32 to vector<16x32xf32>
    %23 = arith.mulf %22, %19 : vector<16x32xf32>
    %24 = arith.select %21, %19, %23 : vector<16x32xi1>, vector<16x32xf32>
    %c0_19 = arith.constant 0 : index
    %c0_20 = arith.constant 0 : index
    %25 = vector.load %arg8[%c0_19, %c0_20] : memref<32x32xf32, #tpu.memory_space<vmem>>, vector<32x32xf32>
    %cst_21 = arith.constant dense<0.000000e+00> : vector<16x32xf32>
    %26 = tpu.matmul %24, %25, %cst_21 {dimension_numbers = #tpu.dot_dimension_numbers<[1], [0], [0], [1], [0, 0, 1, 1], [], []>} : vector<16x32xf32>, vector<32x32xf32>, vector<16x32xf32> -> vector<16x32xf32>
    %c0_22 = arith.constant 0 : index
    %c0_23 = arith.constant 0 : index
    %27 = vector.load %arg9[%c0_22, %c0_23] : memref<1x32xf32, #tpu.memory_space<vmem>>, vector<1x32xf32>
    %28 = vector.broadcast %27 : vector<1x32xf32> to vector<16x32xf32>
    %29 = arith.addf %26, %28 : vector<16x32xf32>
    %cst_24 = arith.constant 0.000000e+00 : f32
    %30 = vector.broadcast %cst_24 : f32 to vector<16x32xf32>
    %31 = arith.cmpf ogt, %29, %30 : vector<16x32xf32>
    %cst_25 = arith.constant 0.00999999977 : f32
    %32 = vector.broadcast %cst_25 : f32 to vector<16x32xf32>
    %33 = arith.mulf %32, %29 : vector<16x32xf32>
    %34 = arith.select %31, %29, %33 : vector<16x32xi1>, vector<16x32xf32>
    %c0_26 = arith.constant 0 : index
    %c0_27 = arith.constant 0 : index
    %35 = vector.load %arg10[%c0_26, %c0_27] : memref<32x128xf32, #tpu.memory_space<vmem>>, vector<32x128xf32>
    %cst_28 = arith.constant dense<0.000000e+00> : vector<16x128xf32>
    %36 = tpu.matmul %34, %35, %cst_28 {dimension_numbers = #tpu.dot_dimension_numbers<[1], [0], [0], [1], [0, 0, 1, 1], [], []>} : vector<16x32xf32>, vector<32x128xf32>, vector<16x128xf32> -> vector<16x128xf32>
    %c0_29 = arith.constant 0 : index
    %c0_30 = arith.constant 0 : index
    %37 = vector.load %arg11[%c0_29, %c0_30] : memref<1x128xf32, #tpu.memory_space<vmem>>, vector<1x128xf32>
    %38 = vector.broadcast %37 : vector<1x128xf32> to vector<16x128xf32>
    %39 = arith.addf %36, %38 : vector<16x128xf32>
    %c0_31 = arith.constant 0 : index
    %c0_32 = arith.constant 0 : index
    %40 = vector.load %arg12[%c0_31, %c0_32] : memref<16x128xf32, #tpu.memory_space<vmem>>, vector<16x128xf32>
    tpu.vector_store %arg12[%c0_31, %c0_32], %39 {strides = array<i32>} : memref<16x128xf32, #tpu.memory_space<vmem>>, vector<16x128xf32>,
    return
  }
  func.func @transform_0(%arg0: i32) -> (i32, i32) {
    %c0_i32 = arith.constant 0 : i32
    %c0_i32_0 = arith.constant 0 : i32
    return %arg0, %c0_i32 : i32, i32
  }
  func.func @transform_1(%arg0: i32) -> (i32, i32) {
    %c0_i32 = arith.constant 0 : i32
    %c0_i32_0 = arith.constant 0 : i32
    return %arg0, %c0_i32 : i32, i32
  }
  func.func @transform_2(%arg0: i32) -> (i32, i32) {
    %c0_i32 = arith.constant 0 : i32
    %c0_i32_0 = arith.constant 0 : i32
    %c0_i32_1 = arith.constant 0 : i32
    return %c0_i32, %c0_i32_0 : i32, i32
  }
  func.func @transform_3(%arg0: i32) -> (i32, i32) {
    %c0_i32 = arith.constant 0 : i32
    %c0_i32_0 = arith.constant 0 : i32
    %c0_i32_1 = arith.constant 0 : i32
    return %c0_i32, %c0_i32_0 : i32, i32
  }
  func.func @transform_4(%arg0: i32) -> (i32, i32) {
    %c0_i32 = arith.constant 0 : i32
    %c0_i32_0 = arith.constant 0 : i32
    %c0_i32_1 = arith.constant 0 : i32
    return %c0_i32, %c0_i32_0 : i32, i32
  }
  func.func @transform_5(%arg0: i32) -> (i32, i32) {
    %c0_i32 = arith.constant 0 : i32
    %c0_i32_0 = arith.constant 0 : i32
    %c0_i32_1 = arith.constant 0 : i32
    return %c0_i32, %c0_i32_0 : i32, i32
  }
  func.func @transform_6(%arg0: i32) -> (i32, i32) {
    %c0_i32 = arith.constant 0 : i32
    %c0_i32_0 = arith.constant 0 : i32
    %c0_i32_1 = arith.constant 0 : i32
    return %c0_i32, %c0_i32_0 : i32, i32
  }
  func.func @transform_7(%arg0: i32) -> (i32, i32) {
    %c0_i32 = arith.constant 0 : i32
    %c0_i32_0 = arith.constant 0 : i32
    %c0_i32_1 = arith.constant 0 : i32
    return %c0_i32, %c0_i32_0 : i32, i32
  }
  func.func @transform_8(%arg0: i32) -> (i32, i32) {
    %c0_i32 = arith.constant 0 : i32
    %c0_i32_0 = arith.constant 0 : i32
    %c0_i32_1 = arith.constant 0 : i32
    return %c0_i32, %c0_i32_0 : i32, i32
  }
  func.func @transform_9(%arg0: i32) -> (i32, i32) {
    %c0_i32 = arith.constant 0 : i32
    %c0_i32_0 = arith.constant 0 : i32
    %c0_i32_1 = arith.constant 0 : i32
    return %c0_i32, %c0_i32_0 : i32, i32
  }
  func.func @transform_10(%arg0: i32) -> (i32, i32) {
    %c0_i32 = arith.constant 0 : i32
    %c0_i32_0 = arith.constant 0 : i32
    %c0_i32_1 = arith.constant 0 : i32
    return %c0_i32, %c0_i32_0 : i32, i32
  }
  func.func @transform_11(%arg0: i32) -> (i32, i32) {
    %c0_i32 = arith.constant 0 : i32
    %c0_i32_0 = arith.constant 0 : i32
    return %arg0, %c0_i32 : i32, i32
  }
}

</mosaic_0001>

<bundles_post_ra>
// kernel: maml_forward.1
= control target key start
LH: loop header
LB: loop body
LE: loop exit
PB: predicated region body
PF: predicated region fallthrough
CT: control target
= control target key end

     0   :  { %16 = vsyncpa [#allocation3], 0  ;;  %s1022_s0 = inlined_call_operand.vmem [shape: f32[16,78], index: 0, kind: input, shape index: {}]   ;;  %s1023_s1 = inlined_call_operand.hbm [shape: f32[16,16], index: 1, kind: input, shape index: {}]   ;;  %s1024_s2 = inlined_call_operand.vmem [shape: f32[78,32], index: 2, kind: input, shape index: {}]   ;;  %s1025_s3 = inlined_call_operand.hbm [shape: f32[16,32], index: 3, kind: input, shape index: {}]   ;;  %s1026_s4 = inlined_call_operand.vmem [shape: f32[1,32], index: 4, kind: input, shape index: {}]   ;;  %s1027_s5 = inlined_call_operand.vmem [shape: f32[32,32], index: 5, kind: input, shape index: {}]   ;;  %s1028_s6 = inlined_call_operand.vmem [shape: f32[1,32], index: 6, kind: input, shape index: {}]   ;;  %s1029_s7 = inlined_call_operand.vmem [shape: f32[32,32], index: 7, kind: input, shape index: {}]   ;;  %s1030_s8 = inlined_call_operand.vmem [shape: f32[1,32], index: 8, kind: input, shape index: {}]   ;;  %s1031_s9 = inlined_call_operand.vmem [shape: f32[32,128], index: 9, kind: input, shape index: {}]   ;;  %s1032_s10 = inlined_call_operand.vmem [shape: f32[1,128], index: 10, kind: input, shape index: {}]   ;;  %s1033_s11 = inlined_call_operand.hbm [shape: f32[16,128], index: 11, kind: output, shape index: {}]  }
   0x1   :  { %17 = vsyncpa [#allocation6], 0 }
   0x2   :  { %18 = vsyncpa [#allocation4], 0  ;;  %s817_s17 = smov [#allocation2]   ;;  %s745_s21 = scalar_lea.hbm %s1023_s1, 256 }
   0x3   :  { %s26_s18 = sshll.u32 %s817_s17, 4  ;;  %p746_p0 = scmp.ne.s32.totalorder %s1023_s1, %s745_s21  ;;  %s27_s18 = int_to_ptr.vmem [resolvable:$true] %s26_s18 }
   0x4   :  { %p749_p1 = scmp.lt.u32.totalorder %s745_s21, %s1023_s1 }
   0x6   :  { %p751_p2 = pnand %p749_p1, %p746_p0 }
   0x8   :  { %754 = shalt.err (!%p751_p2)
}
   0x9   :  { %s755_s26 = scalar_lea.vmem %s27_s18, 256  ;;  %p760_p4 = scmp.lt.s32.totalorder %s27_s18, %s27_s18 }
   0xa   :  { %p756_p3 = scmp.ne.s32.totalorder %s27_s18, %s755_s26  ;;  %p761_p5 = scmp.lt.s32.totalorder %s755_s26, %s755_s26 }
   0xc   :  { %p762_p6 = por %p761_p5, %p760_p4 }
   0xe   :  { %p763_p7 = pnand %p762_p6, %p756_p3 }
  0x10   :  { %766 = shalt.err (!%p763_p7)
}
  0x11   :  { %s818_s27 = smov 128   ;;  %s819_s28 = smov 8  }
  0x12   :  { %32 = dma.hbm_to_vmem [thread:$0]  %s1023_s1, 256, %s27_s18, [#allocation3], %s818_s27, %s818_s27, %s819_s28  }
  0x13   :  { %s820_s12 = smov [#allocation5]   ;;  %s767_s16 = scalar_lea.hbm %s1025_s3, 256 }
  0x14   :  { %s40_s13 = sshll.u32 %s820_s12, 4  ;;  %p768_p8 = scmp.ne.s32.totalorder %s1025_s3, %s767_s16  ;;  %s41_s13 = int_to_ptr.vmem [resolvable:$true] %s40_s13 }
  0x15   :  { %p771_p9 = scmp.lt.u32.totalorder %s767_s16, %s1025_s3 }
  0x17   :  { %p773_p10 = pnand %p771_p9, %p768_p8 }
  0x19   :  { %776 = shalt.err (!%p773_p10)
}
  0x1a   :  { %s777_s22 = scalar_lea.vmem %s41_s13, 256  ;;  %p782_p12 = scmp.lt.s32.totalorder %s41_s13, %s41_s13 }
  0x1b   :  { %p778_p11 = scmp.ne.s32.totalorder %s41_s13, %s777_s22  ;;  %p783_p13 = scmp.lt.s32.totalorder %s777_s22, %s777_s22 }
  0x1d   :  { %p784_p0 = por %p783_p13, %p782_p12 }
  0x1f   :  { %p785_p1 = pnand %p784_p0, %p778_p11 }
  0x21   :  { %788 = shalt.err (!%p785_p1)
}
  0x22   :  { %46 = dma.hbm_to_vmem [thread:$0]  %s1025_s3, 256, %s41_s13, [#allocation6], %s818_s27, %s818_s27, %s819_s28  }
  0x23   :  { %811 = dma.done.wait [#allocation3], 256  }
  0x24   :  { %812 = vsyncadd [#allocation3], 4294967040 }
  0x25   :  { %813 = dma.done.wait [#allocation6], 256  }
  0x26   :  { %814 = vsyncadd [#allocation6], 4294967040  ;;  %vm83_vm0 = vcmask 130048   ;;  %v81_v0 = vld [vmem:[#allocation5] sm:$0xff]  ;;  %v82_v1 = vld [vmem:[#allocation5 + $0x8] sm:$0xff]  ;;  %vm165_vm1 = vcmask 637952  }
  0x27   :  { %v69_v2 = vld [vmem:[#allocation2] sm:$0xff]  ;;  %v687_v3 = vpack.c.bf16 %v82_v1, %v81_v0  ;;  %v72_v5 = vld [vmem:[%s1024_s2 + $0x8] sm:$0xff]  ;;  %v73_v7 = vld [vmem:[%s1024_s2 + $0x10] sm:$0xff]  ;;  %vm172_vm2 = vcmask 1045504   ;;  %vm821_vm3 = vmmov 1   ;;  %vm277_vm7 = vcmask 261120  }
  0x28   :  { %628 = vmatprep.mubr.msk.f32.mxu0 %vm83_vm0, %v69_v2  ;;  %v71_v4 = vld [vmem:[%s1024_s2] sm:$0xff]  ;;  %v74_v8 = vld [vmem:[%s1024_s2 + $0x18] sm:$0xff]  ;;  %v70_v9 = vld [vmem:[#allocation2 + $0x8] sm:$0xff]  ;;  %s822_s15 = smov [#allocation7]  }
  0x29   :  { %v691_v6 = vpack.c.bf16 %v72_v5, %v71_v4  ;;  %688 = vmatprep.subr.bf16.mxu0 %v687_v3  ;;  %v695_v10 = vpack.c.bf16 %v74_v8, %v73_v7  ;;  %v67_v11 = vld [vmem:[%s1022_s0] sm:$0xff]  ;;  %v76_v13 = vld [vmem:[%s1024_s2 + $0x28] sm:$0xff]  ;;  %v77_v15 = vld [vmem:[%s1024_s2 + $0x30] sm:$0xff] }
  0x2a   :  { %690 = vmatpush3.bf16.msra.mxu0 %v687_v3  ;;  %v75_v12 = vld [vmem:[%s1024_s2 + $0x20] sm:$0xff]  ;;  %v78_v16 = vld [vmem:[%s1024_s2 + $0x38] sm:$0xff]  ;;  %v80_v19 = vld [vmem:[%s1024_s2 + $0x48] sm:$0x3f] }
  0x2b   :  { %692 = vmatprep.subr.bf16.mxu0 %v691_v6  ;;  %v699_v14 = vpack.c.bf16 %v76_v13, %v75_v12  ;;  %v703_v17 = vpack.c.bf16 %v78_v16, %v77_v15  ;;  %v79_v18 = vld [vmem:[%s1024_s2 + $0x40] sm:$0xff]  ;;  %vm708_vm4 = vmpackc.low %vm172_vm2, %vm821_vm3  ;;  %v68_v21 = vld [vmem:[%s1022_s0 + $0x8] sm:$0xff] }
  0x2c   :  { %v707_v20 = vpack.c.bf16 %v80_v19, %v79_v18  ;;  %v266_v22 = vld [vmem:[%s1027_s5] sm:$0xff]  ;;  %v267_v23 = vld [vmem:[%s1027_s5 + $0x8] sm:$0xff]  ;;  %v268_v25 = vld [vmem:[%s1027_s5 + $0x10] sm:$0xff] }
  0x2d   :  { %629 = vmatmul.mubr.msk.f32.vlgmr.msra.gmra.mrb[0].mxu0 %vm83_vm0, %v70_v9  ;;  %v713_v24 = vpack.c.bf16 %v267_v23, %v266_v22  ;;  %v269_v26 = vld [vmem:[%s1027_s5 + $0x18] sm:$0xff]  ;;  %v580_v28 = vld [vmem:[%s1026_s4] ss:$0 sm:$0xff]  ;;  %v366_v38 = vld [vmem:[%s1029_s7 + $0x8] sm:$0xff] }
  0x2e   :  { %694 = vmatpush3.bf16.msra.mxu0 %v691_v6  ;;  %651 = vmatprep.mubr.msk.f32.mxu0 %vm165_vm1, %v67_v11  ;;  %v717_v27 = vpack.c.bf16 %v269_v26, %v268_v25  ;;  %v365_v37 = vld [vmem:[%s1029_s7] sm:$0xff]  ;;  %v367_v40 = vld [vmem:[%s1029_s7 + $0x10] sm:$0xff]  ;;  %v368_v41 = vld [vmem:[%s1029_s7 + $0x18] sm:$0xff] }
  0x2f   :  { %696 = vmatprep.subr.bf16.mxu0 %v695_v10  ;;  %714 = vmatprep.subr.bf16.mxu1 %v713_v24  ;;  %v721_v39 = vpack.c.bf16 %v366_v38, %v365_v37  ;;  %v725_v42 = vpack.c.bf16 %v368_v41, %v367_v40  ;;  %v581_v43 = vld [vmem:[%s1028_s6] ss:$0 sm:$0xff]  ;;  %v464_v53 = vld [vmem:[%s1031_s9 + $0x8] sm:$0xff]  ;;  %v465_v55 = vld [vmem:[%s1031_s9 + $0x10] sm:$0xff] }
  0x30   :  { %716 = vmatpush3.bf16.msra.mxu1 %v713_v24  ;;  %v463_v52 = vld [vmem:[%s1031_s9] sm:$0xff]  ;;  %v466_v56 = vld [vmem:[%s1031_s9 + $0x18] sm:$0xff] }
  0x31   :  { %718 = vmatprep.subr.bf16.mxu1 %v717_v27  ;;  %v729_v54 = vpack.c.bf16 %v464_v53, %v463_v52  ;;  %v733_v57 = vpack.c.bf16 %v466_v56, %v465_v55  ;;  %v584_v58 = vld [vmem:[%s1030_s8] ss:$0 sm:$0xff]  ;;  %s562_s8 = sshll.u32 %s822_s15, 4  ;;  %s563_s8 = int_to_ptr.vmem [resolvable:$true] %s562_s8 }
  0x32   :  { %698 = vmatpush3.bf16.msra.mxu0 %v695_v10  ;;  %v587_v3 = vld [vmem:[%s1032_s10] ss:$0 sm:$0xff]  ;;  %s789_s16 = scalar_lea.vmem %s563_s8, 256  ;;  %p794_p3 = scmp.lt.s32.totalorder %s563_s8, %s563_s8 }
  0x33   :  { %700 = vmatprep.subr.bf16.mxu0 %v699_v14  ;;  %p790_p2 = scmp.ne.s32.totalorder %s563_s8, %s789_s16  ;;  %p795_p4 = scmp.lt.s32.totalorder %s789_s16, %s789_s16 }
  0x34   :  { %720 = vmatpush3.bf16.msra.mxu1 %v717_v27 }
  0x35   :  { %722 = vmatprep.subr.bf16.mxu1 %v721_v39  ;;  %p796_p5 = por %p795_p4, %p794_p3 }
  0x36   :  { %702 = vmatpush3.bf16.msra.mxu0 %v699_v14 }
  0x37   :  { %704 = vmatprep.subr.bf16.mxu0 %v703_v17  ;;  %p797_p6 = pnand %p796_p5, %p790_p2 }
  0x3a   :  { %706 = vmatpush3.bf16.msra.mxu0 %v703_v17 }
  0x3b   :  { %709 = vmatprep.subr.msk.bf16.mxu0 %vm708_vm4, %v707_v20 }
  0x3e   :  { %712 = vmatpush3.bf16.msk.msra.mxu0 %vm708_vm4, %v707_v20 }
  0x41   :  { %652 = vmatmul.mubr.msk.f32.vlgmr.msra.gmra.mrb[0].mxu0 %vm165_vm1, %v68_v21 }
 0x114   :  { %v653_v29 = vpop.f32.mrb[0].mxu0 }
 0x115   :  { %v259_v30 = vadd.f32 %v653_v29, %v580_v28  ;;  %v242_v31 = vpop.f32.mrb[1].mxu0 }
 0x116   :  { %v258_v32 = vadd.f32 %v580_v28, %v242_v31 }
 0x117   :  { %v263_v33 = vmul.f32 0.01, %v259_v30  ;;  %vm261_vm5 = vcmp.gt.f32.partialorder %v259_v30, 0.0 }
 0x118   :  { %vm260_vm6 = vcmp.gt.f32.partialorder %v258_v32, 0.0  ;;  %v262_v34 = vmul.f32 0.01, %v258_v32 }
 0x119   :  { %v265_v36 = vsel %vm261_vm5, %v259_v30, %v263_v33 }
 0x11a   :  { %v264_v35 = vsel %vm260_vm6, %v258_v32, %v262_v34 }
 0x11b   :  { %662 = vmatprep.mubr.msk.f32.mxu1 %vm277_vm7, %v264_v35 }
 0x11c   :  { %663 = vmatmul.mubr.msk.f32.vlgmr.msra.gmra.mrb[0].mxu1 %vm277_vm7, %v265_v36 }
 0x11d   :  { %724 = vmatpush3.bf16.msra.mxu1 %v721_v39 }
 0x11e   :  { %726 = vmatprep.subr.bf16.mxu1 %v725_v42 }
 0x121   :  { %728 = vmatpush3.bf16.msra.mxu1 %v725_v42 }
 0x122   :  { %730 = vmatprep.subr.bf16.mxu1 %v729_v54 }
 0x1ef   :  { %v664_v44 = vpop.f32.mrb[0].mxu1 }
 0x1f0   :  { %v356_v45 = vadd.f32 %v664_v44, %v581_v43  ;;  %v350_v46 = vpop.f32.mrb[1].mxu1 }
 0x1f1   :  { %v351_v47 = vadd.f32 %v581_v43, %v350_v46 }
 0x1f2   :  { %v362_v48 = vmul.f32 0.01, %v356_v45  ;;  %vm360_vm8 = vcmp.gt.f32.partialorder %v356_v45, 0.0 }
 0x1f3   :  { %vm359_vm9 = vcmp.gt.f32.partialorder %v351_v47, 0.0  ;;  %v361_v49 = vmul.f32 0.01, %v351_v47 }
 0x1f4   :  { %v364_v51 = vsel %vm360_vm8, %v356_v45, %v362_v48 }
 0x1f5   :  { %v363_v50 = vsel %vm359_vm9, %v351_v47, %v361_v49 }
 0x1f6   :  { %673 = vmatprep.mubr.msk.f32.mxu1 %vm277_vm7, %v363_v50 }
 0x1f7   :  { %674 = vmatmul.mubr.msk.f32.vlgmr.msra.gmra.mrb[2].mxu1 %vm277_vm7, %v364_v51 }
 0x1f8   :  { %732 = vmatpush3.bf16.msra.mxu1 %v729_v54 }
 0x1f9   :  { %734 = vmatprep.subr.bf16.mxu1 %v733_v57 }
 0x1fc   :  { %736 = vmatpush3.bf16.msra.mxu1 %v733_v57 }
 0x2ca   :  { %v675_v59 = vpop.f32.mrb[2].mxu1 }
 0x2cb   :  { %v454_v60 = vadd.f32 %v675_v59, %v584_v58  ;;  %v448_v61 = vpop.f32.mrb[3].mxu1 }
 0x2cc   :  { %v449_v62 = vadd.f32 %v584_v58, %v448_v61 }
 0x2cd   :  { %v460_v63 = vmul.f32 0.01, %v454_v60  ;;  %vm458_vm10 = vcmp.gt.f32.partialorder %v454_v60, 0.0 }
 0x2ce   :  { %vm457_vm11 = vcmp.gt.f32.partialorder %v449_v62, 0.0  ;;  %v459_v0 = vmul.f32 0.01, %v449_v62 }
 0x2cf   :  { %v462_v2 = vsel %vm458_vm10, %v454_v60, %v460_v63 }
 0x2d0   :  { %v461_v1 = vsel %vm457_vm11, %v449_v62, %v459_v0 }
 0x2d1   :  { %684 = vmatprep.mubr.msk.f32.mxu1 %vm277_vm7, %v461_v1 }
 0x2d2   :  { %685 = vmatmul.mubr.msk.f32.vlgmr.msra.gmra.mrb[4].mxu1 %vm277_vm7, %v462_v2 }
 0x3a5   :  { %v686_v4 = vpop.f32.mrb[4].mxu1 }
 0x3a6   :  { %v552_v5 = vadd.f32 %v686_v4, %v587_v3  ;;  %v546_v6 = vpop.f32.mrb[5].mxu1 }
 0x3a7   :  { %v547_v7 = vadd.f32 %v587_v3, %v546_v6 }
 0x3a8   :  { %556 = vst [vmem:[#allocation7 + $0x8] sm:$0xff] %v552_v5 }
 0x3a9   :  { %555 = vst [vmem:[#allocation7] sm:$0xff] %v547_v7 }
 0x3aa   :  { %800 = shalt.err (!%p797_p6)
}
 0x3ab   :  { %s801_s10 = scalar_lea.hbm %s1033_s11, 256 }
 0x3ac   :  { %p802_p7 = scmp.ne.s32.totalorder %s1033_s11, %s801_s10  ;;  %p805_p8 = scmp.lt.u32.totalorder %s801_s10, %s1033_s11 }
 0x3ae   :  { %p807_p9 = pnand %p805_p8, %p802_p7 }
 0x3b0   :  { %810 = shalt.err (!%p807_p9)
}
 0x3b1   :  { %568 = dma.vmem_to_hbm [thread:$0]  %s563_s8, 256, %s1033_s11, [#allocation4], %s818_s27, %s818_s27, %s819_s28  }
 0x3b2   :  { %815 = dma.done.wait [#allocation4], 256  }
 0x3b3   :  { %816 = vsyncadd [#allocation4], 4294967040 }
 0x3b4   :  { %572 = vsyncpa [#allocation3], 1 }
 0x3b5   :  { %573 = vsyncpa [#allocation6], 1 }
 0x3b6   :  { %574 = vsyncpa [#allocation4], 1 }

</bundles_post_ra>
